<compile_context>
chip_gen: v5e
topology: v5e:2x2
jax: 0.10.0
libtpu: 0.0.40
codegen_flags: <defaults>
</compile_context>

<pallas_src>
import jax
import jax.numpy as jnp
import numpy as np
from jax.experimental import pallas as pl
from jax.experimental.pallas import tpu as pltpu


def grouped_ffn_kernel(block_expert_ref,   # [num_blocks] int32 (SMEM scalar prefetch)
                       x_ref,              # [TT, D]  bf16  grouped+padded tokens
                       gate_ref,           # [TT, 1]  f32   router gate (0 on padding)
                       w1_ref,             # [D, H]   bf16  this tile's expert
                       b1_ref,             # [1, H]   f32
                       w2_ref,             # [H, D]   bf16
                       b2_ref,             # [1, D]   f32
                       out_ref):           # [TT, D]
    del block_expert_ref  # consumed only by the index_maps
    x = x_ref[...]
    h = jnp.dot(x, w1_ref[...], preferred_element_type=jnp.float32) + b1_ref[...]
    h = jnp.maximum(h, 0.0)
    y = jnp.dot(h.astype(x.dtype), w2_ref[...],
                preferred_element_type=jnp.float32) + b2_ref[...]
    out_ref[...] = (gate_ref[...] * y).astype(out_ref.dtype)


def switch_ffn(x, wr, br, w1, b1, w2, b2, *, tile_tokens=16):
    """x: [T, D] -> [T, D].  Top-1 Switch FFN with E experts (grouped matmul)."""
    T, D = x.shape
    E, _, H = w1.shape
    TT = tile_tokens
    assert TT % 8 == 0, "token tile must be a multiple of 8 (sublane)"

    xf = x.astype(jnp.float32)

    # ---- router (top-1) in plain JAX ----
    logits = xf @ wr.astype(jnp.float32) + br.astype(jnp.float32)
    probs = jax.nn.softmax(logits, axis=-1)
    expert_idx = jnp.argmax(probs, axis=-1).astype(jnp.int32)           # [T]
    gate = jnp.max(probs, axis=-1, keepdims=True).astype(jnp.float32)   # [T, 1]

    # ---- group tokens by expert into a block-aligned padded layout ----
    T_pad = (pl.cdiv(T, TT) + E) * TT          # static worst-case padded size
    num_blocks = T_pad // TT

    sort_idx = jnp.argsort(expert_idx).astype(jnp.int32)     # token ids grouped by expert
    sorted_eid = expert_idx[sort_idx]
    group_sizes = jnp.bincount(expert_idx, length=E).astype(jnp.int32)
    padded_sizes = ((group_sizes + TT - 1) // TT) * TT
    group_starts = jnp.concatenate(
        [jnp.zeros((1,), jnp.int32), jnp.cumsum(padded_sizes)[:-1].astype(jnp.int32)])
    token_starts = jnp.concatenate(
        [jnp.zeros((1,), jnp.int32), jnp.cumsum(group_sizes)[:-1].astype(jnp.int32)])
    rank = jnp.arange(T, dtype=jnp.int32) - token_starts[sorted_eid]
    dest = group_starts[sorted_eid] + rank                    # [T] slot in padded layout

    # slot -> original-token map (single cheap int32 scatter), then row GATHERS
    slot_to_token = jnp.full((T_pad,), -1, jnp.int32).at[dest].set(sort_idx)
    valid = (slot_to_token >= 0)
    safe_tok = jnp.maximum(slot_to_token, 0)

    x_bf = xf.astype(jnp.bfloat16)
    x_grouped = jnp.where(valid[:, None], x_bf[safe_tok], jnp.bfloat16(0))    # [T_pad, D]
    gate_grouped = jnp.where(valid[:, None], gate[safe_tok], 0.0)             # [T_pad, 1]

    # expert owning each token tile (pure-padding tiles clamp to E-1; gate=0 there)
    ends = jnp.cumsum(padded_sizes)
    block_starts = jnp.arange(num_blocks, dtype=jnp.int32) * TT
    block_expert = jnp.minimum(
        jnp.searchsorted(ends, block_starts, side="right"), E - 1).astype(jnp.int32)

    # bf16 matmul inputs, f32 biases (added to the f32 accumulators)
    w1_bf = w1.astype(jnp.bfloat16)
    w2_bf = w2.astype(jnp.bfloat16)
    b1_f = b1.astype(jnp.float32)
    b2_f = b2.astype(jnp.float32)

    y_grouped = pl.pallas_call(
        grouped_ffn_kernel,
        out_shape=jax.ShapeDtypeStruct((T_pad, D), x.dtype),
        grid_spec=pltpu.PrefetchScalarGridSpec(
            num_scalar_prefetch=1,
            grid=(num_blocks,),
            in_specs=[
                pl.BlockSpec((TT, D), lambda t, be: (t, 0)),              # x tile
                pl.BlockSpec((TT, 1), lambda t, be: (t, 0)),              # gate tile
                pl.BlockSpec((None, D, H), lambda t, be: (be[t], 0, 0)),  # W1[expert]
                pl.BlockSpec((None, 1, H), lambda t, be: (be[t], 0, 0)),  # b1[expert]
                pl.BlockSpec((None, H, D), lambda t, be: (be[t], 0, 0)),  # W2[expert]
                pl.BlockSpec((None, 1, D), lambda t, be: (be[t], 0, 0)),  # b2[expert]
            ],
            out_specs=pl.BlockSpec((TT, D), lambda t, be: (t, 0)),
        ),
        compiler_params=pltpu.CompilerParams(
            dimension_semantics=("parallel",),
            vmem_limit_bytes=48 * 1024 * 1024,
        ),
    )(block_expert, x_grouped, gate_grouped, w1_bf, b1_f, w2_bf, b2_f)

    # unsort: original token t lives in slot token_slot[t]  (gather, not scatter)
    token_slot = jnp.zeros((T,), jnp.int32).at[sort_idx].set(dest)
    return y_grouped[token_slot]


def expert_ffn_unique(hidden_states, params, tile_tokens=16):
    """hidden_states: [B, S, D] -> [B, S, D]"""
    B, S, D = hidden_states.shape
    x = hidden_states.reshape(B * S, D)
    y = switch_ffn(x, params["wr"], params["br"],
                   params["w1"], params["b1"], params["w2"], params["b2"],
                   tile_tokens=tile_tokens)
    return y.reshape(B, S, D)


def _reference(hidden_states, params):
    """Dense reference with the same numerics (f32 router, bf16 FFN matmuls, f32 acc)."""
    B, S, D = hidden_states.shape
    E = params["w1"].shape[0]
    x = hidden_states.reshape(B * S, D).astype(jnp.float32)
    logits = x @ params["wr"] + params["br"]
    probs = jax.nn.softmax(logits, axis=-1)
    idx = jnp.argmax(probs, axis=-1)
    gate = jnp.max(probs, axis=-1, keepdims=True)
    xb = x.astype(jnp.bfloat16)
    outs = []
    for e in range(E):
        h = jnp.dot(xb, params["w1"][e].astype(jnp.bfloat16),
                    preferred_element_type=jnp.float32) + params["b1"][e]
        h = jnp.maximum(h, 0.0)
        y = jnp.dot(h.astype(jnp.bfloat16), params["w2"][e].astype(jnp.bfloat16),
                    preferred_element_type=jnp.float32) + params["b2"][e]
        outs.append(y)
    outs = jnp.stack(outs, axis=0)                       # [E, T, D]
    y = jnp.take_along_axis(outs, idx[None, :, None], axis=0)[0]
    return (gate * y).astype(hidden_states.dtype).reshape(B, S, D)


if __name__ == "__main__":
    B, S, D, H, E = 2, 8, 32, 64, 4
    key = jax.random.PRNGKey(0)
    k = jax.random.split(key, 8)

    hidden_states = jax.random.normal(k[0], (B, S, D), dtype=jnp.float32)
    params = {
        "wr": 0.1 * jax.random.normal(k[1], (D, E), dtype=jnp.float32),
        "br": jnp.zeros((1, E), dtype=jnp.float32),
        "w1": 0.05 * jax.random.normal(k[2], (E, D, H), dtype=jnp.float32),
        "b1": 0.01 * jax.random.normal(k[3], (E, 1, H), dtype=jnp.float32),
        "w2": 0.05 * jax.random.normal(k[4], (E, H, D), dtype=jnp.float32),
        "b2": 0.01 * jax.random.normal(k[5], (E, 1, D), dtype=jnp.float32),
    }

    out = expert_ffn_unique(hidden_states, params, tile_tokens=16)
    out = jax.block_until_ready(out)

    ref = _reference(hidden_states, params)
    np.testing.assert_allclose(np.asarray(out), np.asarray(ref), rtol=5e-3, atol=5e-4)

    print("KERNEL_OK")
</pallas_src>

<mosaic_0001>
module attributes {stable_mosaic.version = 11 : i64} {
  func.func @grouped_ffn_kernel(%arg0: i32, %arg1: memref<5xi32, #tpu.memory_space<smem>>, %arg2: memref<16x32xbf16, #tpu.memory_space<vmem>>, %arg3: memref<16x1xf32, #tpu.memory_space<vmem>>, %arg4: memref<1x32x64xbf16, #tpu.memory_space<vmem>>, %arg5: memref<1x1x64xf32, #tpu.memory_space<vmem>>, %arg6: memref<1x64x32xbf16, #tpu.memory_space<vmem>>, %arg7: memref<1x1x32xf32, #tpu.memory_space<vmem>>, %arg8: memref<16x32xf32, #tpu.memory_space<vmem>>) attributes {dimension_semantics = [#tpu.dimension_semantics<parallel>], iteration_bounds = array<i64: 5>, scalar_prefetch = 1 : i64, scratch_operands = 0 : i64, tpu.core_type = #tpu.core_type<tc>, window_params = [{transform_indices = @transform_0, window_bounds = array<i64: 16, 32>}, {transform_indices = @transform_1, window_bounds = array<i64: 16, 1>}, {transform_indices = @transform_2, window_bounds = array<i64: 1, 32, 64>}, {transform_indices = @transform_3, window_bounds = array<i64: 1, 1, 64>}, {transform_indices = @transform_4, window_bounds = array<i64: 1, 64, 32>}, {transform_indices = @transform_5, window_bounds = array<i64: 1, 1, 32>}, {transform_indices = @transform_6, window_bounds = array<i64: 16, 32>}]} {
    %c0 = arith.constant 0 : index
    %c0_0 = arith.constant 0 : index
    %0 = vector.load %arg2[%c0, %c0_0] : memref<16x32xbf16, #tpu.memory_space<vmem>>, vector<16x32xbf16>
    %c0_1 = arith.constant 0 : index
    %c0_2 = arith.constant 0 : index
    %c0_3 = arith.constant 0 : index
    %1 = vector.load %arg4[%c0_1, %c0_2, %c0_3] : memref<1x32x64xbf16, #tpu.memory_space<vmem>>, vector<1x32x64xbf16>
    %2 = vector.shape_cast %1 : vector<1x32x64xbf16> to vector<32x64xbf16>
    %cst = arith.constant dense<0.000000e+00> : vector<16x64xf32>
    %3 = tpu.matmul %0, %2, %cst {dimension_numbers = #tpu.dot_dimension_numbers<[1], [0], [0], [1], [0, 0, 1, 1], [], []>} : vector<16x32xbf16>, vector<32x64xbf16>, vector<16x64xf32> -> vector<16x64xf32>
    %c0_4 = arith.constant 0 : index
    %c0_5 = arith.constant 0 : index
    %c0_6 = arith.constant 0 : index
    %4 = vector.load %arg5[%c0_4, %c0_5, %c0_6] : memref<1x1x64xf32, #tpu.memory_space<vmem>>, vector<1x1x64xf32>
    %5 = vector.shape_cast %4 : vector<1x1x64xf32> to vector<1x64xf32>
    %6 = vector.broadcast %5 : vector<1x64xf32> to vector<16x64xf32>
    %7 = arith.addf %3, %6 : vector<16x64xf32>
    %cst_7 = arith.constant 0.000000e+00 : f32
    %8 = vector.broadcast %cst_7 : f32 to vector<16x64xf32>
    %9 = arith.maximumf %7, %8 : vector<16x64xf32>
    %10 = arith.truncf %9 : vector<16x64xf32> to vector<16x64xbf16>
    %c0_8 = arith.constant 0 : index
    %c0_9 = arith.constant 0 : index
    %c0_10 = arith.constant 0 : index
    %11 = vector.load %arg6[%c0_8, %c0_9, %c0_10] : memref<1x64x32xbf16, #tpu.memory_space<vmem>>, vector<1x64x32xbf16>
    %12 = vector.shape_cast %11 : vector<1x64x32xbf16> to vector<64x32xbf16>
    %cst_11 = arith.constant dense<0.000000e+00> : vector<16x32xf32>
    %13 = tpu.matmul %10, %12, %cst_11 {dimension_numbers = #tpu.dot_dimension_numbers<[1], [0], [0], [1], [0, 0, 1, 1], [], []>} : vector<16x64xbf16>, vector<64x32xbf16>, vector<16x32xf32> -> vector<16x32xf32>
    %c0_12 = arith.constant 0 : index
    %c0_13 = arith.constant 0 : index
    %c0_14 = arith.constant 0 : index
    %14 = vector.load %arg7[%c0_12, %c0_13, %c0_14] : memref<1x1x32xf32, #tpu.memory_space<vmem>>, vector<1x1x32xf32>
    %15 = vector.shape_cast %14 : vector<1x1x32xf32> to vector<1x32xf32>
    %16 = vector.broadcast %15 : vector<1x32xf32> to vector<16x32xf32>
    %17 = arith.addf %13, %16 : vector<16x32xf32>
    %c0_15 = arith.constant 0 : index
    %c0_16 = arith.constant 0 : index
    %18 = vector.load %arg3[%c0_15, %c0_16] : memref<16x1xf32, #tpu.memory_space<vmem>>, vector<16x1xf32>
    %19 = vector.broadcast %18 : vector<16x1xf32> to vector<16x32xf32>
    %20 = arith.mulf %19, %17 : vector<16x32xf32>
    %c0_17 = arith.constant 0 : index
    %c0_18 = arith.constant 0 : index
    %21 = vector.load %arg8[%c0_17, %c0_18] : memref<16x32xf32, #tpu.memory_space<vmem>>, vector<16x32xf32>
    tpu.vector_store %arg8[%c0_17, %c0_18], %20 {strides = array<i32>} : memref<16x32xf32, #tpu.memory_space<vmem>>, vector<16x32xf32>,
    return
  }
  func.func @transform_0(%arg0: i32, %arg1: memref<5xi32, #tpu.memory_space<smem>>) -> (i32, i32) {
    %c0_i32 = arith.constant 0 : i32
    %c0_i32_0 = arith.constant 0 : i32
    return %arg0, %c0_i32 : i32, i32
  }
  func.func @transform_1(%arg0: i32, %arg1: memref<5xi32, #tpu.memory_space<smem>>) -> (i32, i32) {
    %c0_i32 = arith.constant 0 : i32
    %c0_i32_0 = arith.constant 0 : i32
    return %arg0, %c0_i32 : i32, i32
  }
  func.func @transform_2(%arg0: i32, %arg1: memref<5xi32, #tpu.memory_space<smem>>) -> (i32, i32, i32) {
    %0 = arith.index_cast %arg0 : i32 to index
    %1 = memref.load %arg1[%0] : memref<5xi32, #tpu.memory_space<smem>>
    %c0_i32 = arith.constant 0 : i32
    %c0_i32_0 = arith.constant 0 : i32
    %c0_i32_1 = arith.constant 0 : i32
    return %1, %c0_i32, %c0_i32_0 : i32, i32, i32
  }
  func.func @transform_3(%arg0: i32, %arg1: memref<5xi32, #tpu.memory_space<smem>>) -> (i32, i32, i32) {
    %0 = arith.index_cast %arg0 : i32 to index
    %1 = memref.load %arg1[%0] : memref<5xi32, #tpu.memory_space<smem>>
    %c0_i32 = arith.constant 0 : i32
    %c0_i32_0 = arith.constant 0 : i32
    %c0_i32_1 = arith.constant 0 : i32
    return %1, %c0_i32, %c0_i32_0 : i32, i32, i32
  }
  func.func @transform_4(%arg0: i32, %arg1: memref<5xi32, #tpu.memory_space<smem>>) -> (i32, i32, i32) {
    %0 = arith.index_cast %arg0 : i32 to index
    %1 = memref.load %arg1[%0] : memref<5xi32, #tpu.memory_space<smem>>
    %c0_i32 = arith.constant 0 : i32
    %c0_i32_0 = arith.constant 0 : i32
    %c0_i32_1 = arith.constant 0 : i32
    return %1, %c0_i32, %c0_i32_0 : i32, i32, i32
  }
  func.func @transform_5(%arg0: i32, %arg1: memref<5xi32, #tpu.memory_space<smem>>) -> (i32, i32, i32) {
    %0 = arith.index_cast %arg0 : i32 to index
    %1 = memref.load %arg1[%0] : memref<5xi32, #tpu.memory_space<smem>>
    %c0_i32 = arith.constant 0 : i32
    %c0_i32_0 = arith.constant 0 : i32
    %c0_i32_1 = arith.constant 0 : i32
    return %1, %c0_i32, %c0_i32_0 : i32, i32, i32
  }
  func.func @transform_6(%arg0: i32, %arg1: memref<5xi32, #tpu.memory_space<smem>>) -> (i32, i32) {
    %c0_i32 = arith.constant 0 : i32
    %c0_i32_0 = arith.constant 0 : i32
    return %arg0, %c0_i32 : i32, i32
  }
}

</mosaic_0001>

<bundles_post_ra>
// kernel: tpu_custom_call.1
= control target key start
LH: loop header
LB: loop body
LE: loop exit
PB: predicated region body
PF: predicated region fallthrough
CT: control target
= control target key end

     0   :  { %s702_s27 = smov [#allocation3]   ;;  %s801_s0 = inlined_call_operand.vmem [shape: s32[5], index: 0, kind: input, shape index: {}]   ;;  %s802_s1 = inlined_call_operand.vmem [shape: bf16[80,32], index: 1, kind: input, shape index: {}]   ;;  %s803_s2 = inlined_call_operand.vmem [shape: f32[80,1], index: 2, kind: input, shape index: {}]   ;;  %s804_s3 = inlined_call_operand.vmem [shape: bf16[4,32,64], index: 3, kind: input, shape index: {}]   ;;  %s805_s4 = inlined_call_operand.vmem [shape: f32[4,1,64], index: 4, kind: input, shape index: {}]   ;;  %s806_s5 = inlined_call_operand.vmem [shape: bf16[4,64,32], index: 5, kind: input, shape index: {}]   ;;  %s807_s6 = inlined_call_operand.vmem [shape: f32[4,1,32], index: 6, kind: input, shape index: {}]   ;;  %s808_s7 = inlined_call_operand.vmem [shape: f32[80,32], index: 7, kind: output, shape index: {}]  }
   0x1   :  { %s13_s26 = sshll.u32 %s801_s0, 4  ;;  %s14_s26 = int_to_ptr.vmem [resolvable:$true] %s13_s26 }
   0x2   :  { %16 = dma.vmem_to_smem %s14_s26, 16, %s702_s27, [#allocation2] }
   0x3   :  { %696 = dma.done.wait [#allocation2], 16 }
   0x4   :  { %697 = vsyncadd [#allocation2], 4294967280 }
   0x5   :  { %19 = sfence }
   0x6   :  { %s747_s28 = smov 0  }
   0x7 LB: > { %s753_s29 = sadd.s32 4294967295, %s700_s28   ;;  %p615_p0 = scmp.ge.s32.totalorder %s700_s28, 1  ;;  %s700_s28 = sphi %s747_s28, %s25_s28  }
   0x8   : > { %p285_p1 = scmp.lt.s32.totalorder %s700_s28, 6 }
   0xa   : > { %p286_p2 = pnand %p615_p0, %p285_p1 }
   0xb   : > { %s352_s0 = sld [smem:[#allocation3 + %s753_s29]] (!%p286_p2)  ;;  %s616_s30 = sshll.u32 (!%p286_p2), %s753_s29, 1 }
   0xc   : > { %289 = sbr.rel (%p286_p2) target bundleno = 309 (0x135), region = 44  ;;  %p341_p3 = scmp.lt.s32.totalorder (!%p286_p2), %s616_s30, 9 }
   0xd   : > { %s359_s8 = sld [smem:[#allocation3 + %s753_s29]] (!%p286_p2) }
   0xe   : > { %s364_s20 = sld [smem:[#allocation3 + %s753_s29]] (!%p286_p2) }
   0xf   : > { %s371_s25 = sld [smem:[#allocation3 + %s753_s29]] (!%p286_p2) }
  0x11   : > { %s810_s30 = smov (!%p341_p3, %s616_s30), 9  ;;  %p353_p4 = scmp.lt.s32.totalorder %s352_s0, 3  ;;  %vm410_vm0 = vcmask 261120   ;;  %v703_v8 = vmov 0   ;;  %vm467_vm1 = vcmask 523264  }
  0x12   : > { %s617_s10 = sshll.u32 %s810_s30, 2  ;;  %s619_s26 = sshll.u32 %s810_s30, 3  ;;  %677 = vset.pattern.permute.xlu0 %v703_v8 }
  0x13   : > { %p360_p5 = scmp.lt.s32.totalorder %s359_s8, 3  ;;  %s812_s0 = smov (!%p353_p4, %s352_s0), 3 }
  0x14   : > { %s658_s9 = sshll.u32 %s812_s0, 4  ;;  %s344_s19 = scalar_lea.vmem %s802_s1, %s617_s10 }
  0x15   : > { %s814_s8 = smov (!%p360_p5, %s359_s8), 3  ;;  %s357_s13 = scalar_lea.vmem %s804_s3, %s658_s9  ;;  %v660_v2 = vld [vmem:[%s344_s19] sm:$0xff] }
  0x16   : > { %s362_s16 = scalar_lea.vmem %s805_s4, %s814_s8  ;;  %v662_v0 = vld [vmem:[%s357_s13 + $0x8] sm:$0xff]  ;;  %v661_v1 = vld [vmem:[%s357_s13] sm:$0xff]  ;;  %p365_p6 = scmp.lt.s32.totalorder %s364_s20, 3 }
  0x17   : > { %420 = vmatpush.bf16.msra.mxu0 %v662_v0  ;;  %p372_p7 = scmp.lt.s32.totalorder %s371_s25, 3  ;;  %s350_s9 = scalar_lea.vmem %s803_s2, %s619_s26  ;;  %v678_v11 = vld [vmem:[%s362_s16] ss:$0 sm:$0xff] }
  0x18   : > { %s816_s20 = smov (!%p365_p6, %s364_s20), 3  ;;  %v485_v7 = vld [vmem:[%s350_s9] sm:$0xff]  ;;  %v486_v9 = vld [vmem:[%s350_s9 + $0x8] sm:$0xff]  ;;  %s380_s15 = scalar_lea.vmem %s808_s7, %s619_s26 }
  0x19   : > { %s659_s21 = sshll.u32 %s816_s20, 5  ;;  %s818_s25 = smov (!%p372_p7, %s371_s25), 3  ;;  %489 = vperm.xlu0 %677, %v485_v7  }
  0x1a   : > { %s369_s24 = scalar_lea.vmem %s806_s5, %s659_s21  ;;  %s374_s12 = scalar_lea.vmem %s807_s6, %s818_s25 }
  0x1b   : > { %421 = vmatpush.bf16.msra.mxu0 %v661_v1  ;;  %v666_v3 = vld [vmem:[%s369_s24 + $0x18] sm:$0xff]  ;;  %v665_v4 = vld [vmem:[%s369_s24 + $0x10] sm:$0xff]  ;;  %v664_v5 = vld [vmem:[%s369_s24 + $0x8] sm:$0xff] }
  0x1c   : > { %475 = vmatpush.bf16.msra.mxu1 %v666_v3  ;;  %v663_v6 = vld [vmem:[%s369_s24] sm:$0xff] }
  0x1d   : > { %v679_v18 = vld [vmem:[%s374_s12] ss:$0 sm:$0xff] }
  0x1e   : > { %638 = vmatmul.msk.bf16.vlgmr.msra.gmra.mxu0 %vm410_vm0, %v660_v2 }
  0x20   : > { %476 = vmatpush.bf16.msra.mxu1 %v665_v4 }
  0x21   : > { %494 = vperm.xlu0 %677, %v486_v9  }
  0x24   : > { %477 = vmatpush.bf16.msra.mxu1 %v664_v5 }
  0x28   : > { %478 = vmatpush.bf16.msra.mxu1 %v663_v6 }
  0x8b   : > { %v490_v19 = vpop.permute.xlu0 %489 }
  0x93   : > { %v495_v25 = vpop.permute.xlu0 %494 }
  0x9b   : > { %v423_v10 = vpop.f32.mrf.mxu0 }
  0x9c   : > { %v424_v12 = vadd.f32 %v678_v11, %v423_v10 }
  0x9e   : > { %v428_v15 = vmax.f32 %v424_v12, 0.0 }
  0xa3   : > { %v425_v13 = vpop.f32.mrf.mxu0 }
  0xa4   : > { %v426_v14 = vadd.f32 %v678_v11, %v425_v13 }
  0xa6   : > { %v429_v16 = vmax.f32 %v426_v14, 0.0 }
  0xa8   : > { %v430_v17 = vpack.c.bf16 %v429_v16, %v428_v15 }
  0xaa   : > { %655 = vmatmul.msk.bf16.vlgmr.msra.gmra.mxu1 %vm467_vm1, %v430_v17 }
 0x127   : > { %v480_v20 = vpop.f32.mrf.mxu1 }
 0x128   : > { %v481_v21 = vadd.f32 %v679_v18, %v480_v20 }
 0x12a   : > { %v497_v22 = vmul.f32 %v490_v19, %v481_v21 }
 0x12c   : > { %499 = vst.msk [vmem:[%s380_s15] sm:$0xff] %vm410_vm0, %v497_v22 }
 0x12f   : > { %v482_v23 = vpop.f32.mrf.mxu1 }
 0x130   : > { %v483_v24 = vadd.f32 %v679_v18, %v482_v23 }
 0x132   : > { %v498_v26 = vmul.f32 %v495_v25, %v483_v24 }
 0x134   : > { %500 = vst.msk [vmem:[%s380_s15 + $0x8] sm:$0xff] %vm410_vm0, %v498_v26 }
 0x135 PF: > { %s25_s28 = sadd.s32 1, %s700_s28  }
 0x136   : > { %p22_p8 = scmp.ge.s32.totalorder %s25_s28, 7  }
 0x138   :  { %24 = sbr.rel (!%p22_p8) target bundleno = 7 (0x7), region = 89 }

</bundles_post_ra>
